<compile_context>
chip_gen: v7x
topology: tpu7x:2x2x1
jax: 0.10.0
libtpu: 0.0.40
codegen_flags: <defaults>
</compile_context>

<pallas_src>
import functools

import numpy as np
import jax
import jax.numpy as jnp
from jax.experimental import pallas as pl
from jax.experimental.pallas import tpu as pltpu


def _s2d_kernel(x_ref, s_ref, o_ref, *, bs, tc, tho):
    """One grid step: (tc, tho*bs, W) -> (tc*bs*bs, tho, Wo).

    x_ref: (tc, tho*bs, W)  input slab (batch dim squeezed by the BlockSpec)
    s_ref: (bs, W, Wo)      column-selection matrices  S[j, w, ow] = (w == ow*bs + j)
    o_ref: (tc*bs*bs, tho, Wo)
    """
    w = x_ref.shape[-1]
    wo = o_ref.shape[-1]
    cdt = s_ref.dtype
    # Channel-batched matmul needs a layout-friendly (tc, tho, W) -> (tc*tho, W)
    # merge; take it only when the merge is free (tho multiple of 8) or trivial.
    merge_channels = (tc == 1) or (tho % 8 == 0)

    for i in range(bs):
        # Row de-interleave: rows[cc, oh, :] = x[cc, oh*bs + i, :]  (strided sublane load,
        # replaces the former P-matrix matmul).
        rows = x_ref[:, pl.ds(i, tho, stride=bs), :]              # (tc, tho, W)
        if merge_channels:
            lhs = rows.reshape(tc * tho, w).astype(cdt)           # fill the MXU M-dim
            for j in range(bs):
                res = jnp.dot(lhs, s_ref[j],
                              preferred_element_type=jnp.float32)  # (tc*tho, Wo)
                res = res.reshape(tc, tho, wo).astype(o_ref.dtype)
                for cc in range(tc):
                    o_ref[(cc * bs + i) * bs + j] = res[cc]
        else:
            for cc in range(tc):
                lhs = rows[cc].astype(cdt)                        # (tho, W)
                for j in range(bs):
                    res = jnp.dot(lhs, s_ref[j],
                                  preferred_element_type=jnp.float32)
                    o_ref[(cc * bs + i) * bs + j] = res.astype(o_ref.dtype)


def _pick_tiles(n, c, ho, w, bs, itemsize, cdt_itemsize, budget):
    """Choose (tc, tho): channels per block and output rows per block, VMEM-budgeted."""

    def need_bytes(tc, tho):
        blk = tc * tho * bs * w * itemsize            # one input block == one output block
        temps = 2 * tc * tho * w * max(cdt_itemsize, 4)   # lhs + f32 matmul result
        sel = bs * w * (w // bs) * cdt_itemsize
        return 4 * blk + temps + sel                  # double-buffered in+out + temporaries

    # Bound static unrolling inside the kernel (tc*bs*bs plane stores per block).
    tc_cap = max(1, 64 // (bs * bs))

    tc, tho = None, ho
    for d in range(min(c, tc_cap), 0, -1):
        if c % d == 0 and need_bytes(d, ho) <= budget:
            tc = d
            break
    if tc is None:
        # Full-height rows do not fit: tile output rows (multiples of 8 keep the
        # (8,128) block constraint satisfied on both input and output blocks).
        tc = 1
        for t in range((ho // 8) * 8, 7, -8):
            if ho % t == 0 and need_bytes(1, t) <= budget:
                tho = t
                break
        # TODO(synk): if Ho has no multiple-of-8 divisor that fits the budget we fall
        # back to full rows and rely on vmem_limit_bytes (pathological only for huge W).

    # v7x megacore: ensure >= 2 grid steps along parallel axes so both TCs get work.
    if n * (c // tc) * (ho // tho) < 2:
        cands = [t for t in range(8, ho, 8)
                 if ho % t == 0 and need_bytes(tc, t) <= budget]
        if cands:
            tho = max(cands)

    return tc, tho, need_bytes(tc, tho)


def space_to_depth(x, *, block_size):
    """SpaceToDepth.forward.  x: (N, C, H, W) -> (N, C*bs*bs, H//bs, W//bs)."""
    bs = int(block_size)
    n, c, h, w = x.shape
    if h % bs or w % bs:
        raise ValueError(f"spatial dims {(h, w)} not divisible by block_size {bs}")
    ho, wo = h // bs, w // bs

    # Compute dtype for the 0/1 column-selection matmul: keep bf16 / f32 native.
    if x.dtype == jnp.float32 or x.dtype == jnp.bfloat16:
        cdt = x.dtype
    else:
        # TODO(synk): integer inputs with |v| >= 2**24 lose precision on this f32 MXU path.
        cdt = np.dtype(np.float32)

    itemsize = np.dtype(x.dtype).itemsize
    cdt_itemsize = np.dtype(cdt).itemsize
    budget = 10 * 1024 * 1024
    tc, tho, need = _pick_tiles(n, c, ho, w, bs, itemsize, cdt_itemsize, budget)

    # Column-selection matrices (trace-time constants, VMEM-resident across the grid).
    s_np = np.zeros((bs, w, wo), np.float32)
    for j in range(bs):
        s_np[j, np.arange(wo) * bs + j, np.arange(wo)] = 1.0
    s = jnp.asarray(s_np, dtype=cdt)

    kernel = functools.partial(_s2d_kernel, bs=bs, tc=tc, tho=tho)

    vmem_limit = int(min(64 << 20, max(32 << 20, 3 * need)))
    cost = pl.CostEstimate(
        flops=2 * n * c * h * w * wo,                 # the remaining 0/1 column matmul
        transcendentals=0,
        bytes_accessed=2 * n * c * h * w * itemsize)

    return pl.pallas_call(
        kernel,
        out_shape=jax.ShapeDtypeStruct((n, c * bs * bs, ho, wo), x.dtype),
        grid_spec=pltpu.PrefetchScalarGridSpec(
            num_scalar_prefetch=0,
            grid=(n, c // tc, ho // tho),
            in_specs=[
                pl.BlockSpec((None, tc, tho * bs, w), lambda b, cb, r: (b, cb, r, 0)),
                pl.BlockSpec((bs, w, wo), lambda b, cb, r: (0, 0, 0)),
            ],
            out_specs=pl.BlockSpec((None, tc * bs * bs, tho, wo),
                                   lambda b, cb, r: (b, cb, r, 0)),
        ),
        compiler_params=pltpu.CompilerParams(
            dimension_semantics=("parallel", "parallel", "parallel"),
            vmem_limit_bytes=vmem_limit),
        cost_estimate=cost,
    )(x, s)


def space_to_depth_ref(x, block_size):
    """Pure-JAX reference (matches torch F.unfold channel ordering)."""
    bs = block_size
    n, c, h, w = x.shape
    y = x.reshape(n, c, h // bs, bs, w // bs, bs)
    y = jnp.transpose(y, (0, 1, 3, 5, 2, 4))
    return y.reshape(n, c * bs * bs, h // bs, w // bs)


if __name__ == "__main__":
    key = jax.random.PRNGKey(0)
    N, C, H, W = 2, 4, 16, 16
    BS = 2

    x = jax.random.normal(key, (N, C, H, W), jnp.float32)

    fwd = jax.jit(functools.partial(space_to_depth, block_size=BS))
    y = fwd(x)
    jax.block_until_ready(y)

    assert y.shape == (N, C * BS * BS, H // BS, W // BS), y.shape
    assert y.dtype == jnp.float32

    ref = space_to_depth_ref(x, BS)
    assert bool(jnp.allclose(y, ref, rtol=1e-5, atol=1e-5)), float(
        jnp.max(jnp.abs(y - ref)))

    print("KERNEL_OK")
</pallas_src>

<mosaic_0001>
module attributes {stable_mosaic.version = 11 : i64} {
  func.func @_s2d_kernel(%arg0: i32, %arg1: i32, %arg2: i32, %arg3: memref<1x4x16x16xf32, #tpu.memory_space<vmem>>, %arg4: memref<2x16x8xf32, #tpu.memory_space<vmem>>, %arg5: memref<1x16x8x8xf32, #tpu.memory_space<vmem>>) attributes {dimension_semantics = [#tpu.dimension_semantics<parallel>, #tpu.dimension_semantics<parallel>, #tpu.dimension_semantics<parallel>], iteration_bounds = array<i64: 2, 1, 1>, scalar_prefetch = 0 : i64, scratch_operands = 0 : i64, tpu.core_type = #tpu.core_type<tc>, window_params = [{transform_indices = @transform_0, window_bounds = array<i64: 1, 4, 16, 16>}, {pipeline_mode = #tpu.pipeline_mode<synchronous>, transform_indices = @transform_1, window_bounds = array<i64: 2, 16, 8>}, {transform_indices = @transform_2, window_bounds = array<i64: 1, 16, 8, 8>}]} {
    %c0 = arith.constant 0 : index
    %c0_0 = arith.constant 0 : index
    %c0_1 = arith.constant 0 : index
    %c0_2 = arith.constant 0 : index
    %0 = tpu.strided_load %arg3[%c0, %c0_0, %c0_1, %c0_2] {strides = array<i32: 1, 1, 2, 1>} : memref<1x4x16x16xf32, #tpu.memory_space<vmem>>, vector<1x4x8x16xf32>
    %1 = vector.shape_cast %0 : vector<1x4x8x16xf32> to vector<4x8x16xf32>
    %2 = vector.shape_cast %1 : vector<4x8x16xf32> to vector<32x16xf32>
    %c0_3 = arith.constant 0 : index
    %c0_4 = arith.constant 0 : index
    %c0_5 = arith.constant 0 : index
    %3 = vector.load %arg4[%c0_3, %c0_4, %c0_5] : memref<2x16x8xf32, #tpu.memory_space<vmem>>, vector<1x16x8xf32>
    %4 = vector.shape_cast %3 : vector<1x16x8xf32> to vector<16x8xf32>
    %cst = arith.constant dense<0.000000e+00> : vector<32x8xf32>
    %5 = tpu.matmul %2, %4, %cst {dimension_numbers = #tpu.dot_dimension_numbers<[1], [0], [0], [1], [0, 0, 1, 1], [], []>} : vector<32x16xf32>, vector<16x8xf32>, vector<32x8xf32> -> vector<32x8xf32>
    %6 = vector.shape_cast %5 : vector<32x8xf32> to vector<4x8x8xf32>
    %7 = vector.extract_strided_slice %6 {offsets = [0, 0, 0], sizes = [1, 8, 8], strides = [1, 1, 1]} : vector<4x8x8xf32> to vector<1x8x8xf32>
    %8 = vector.shape_cast %7 : vector<1x8x8xf32> to vector<8x8xf32>
    %c0_6 = arith.constant 0 : index
    %c0_7 = arith.constant 0 : index
    %c0_8 = arith.constant 0 : index
    %c0_9 = arith.constant 0 : index
    %9 = vector.load %arg5[%c0_6, %c0_7, %c0_8, %c0_9] : memref<1x16x8x8xf32, #tpu.memory_space<vmem>>, vector<1x1x8x8xf32>
    %10 = vector.shape_cast %9 : vector<1x1x8x8xf32> to vector<8x8xf32>
    %11 = vector.shape_cast %8 : vector<8x8xf32> to vector<1x1x8x8xf32>
    tpu.vector_store %arg5[%c0_6, %c0_7, %c0_8, %c0_9], %11 {strides = array<i32>} : memref<1x16x8x8xf32, #tpu.memory_space<vmem>>, vector<1x1x8x8xf32>,
    %12 = vector.extract_strided_slice %6 {offsets = [1, 0, 0], sizes = [1, 8, 8], strides = [1, 1, 1]} : vector<4x8x8xf32> to vector<1x8x8xf32>
    %13 = vector.shape_cast %12 : vector<1x8x8xf32> to vector<8x8xf32>
    %c0_10 = arith.constant 0 : index
    %c4 = arith.constant 4 : index
    %c0_11 = arith.constant 0 : index
    %c0_12 = arith.constant 0 : index
    %14 = vector.load %arg5[%c0_10, %c4, %c0_11, %c0_12] : memref<1x16x8x8xf32, #tpu.memory_space<vmem>>, vector<1x1x8x8xf32>
    %15 = vector.shape_cast %14 : vector<1x1x8x8xf32> to vector<8x8xf32>
    %16 = vector.shape_cast %13 : vector<8x8xf32> to vector<1x1x8x8xf32>
    tpu.vector_store %arg5[%c0_10, %c4, %c0_11, %c0_12], %16 {strides = array<i32>} : memref<1x16x8x8xf32, #tpu.memory_space<vmem>>, vector<1x1x8x8xf32>,
    %17 = vector.extract_strided_slice %6 {offsets = [2, 0, 0], sizes = [1, 8, 8], strides = [1, 1, 1]} : vector<4x8x8xf32> to vector<1x8x8xf32>
    %18 = vector.shape_cast %17 : vector<1x8x8xf32> to vector<8x8xf32>
    %c0_13 = arith.constant 0 : index
    %c8 = arith.constant 8 : index
    %c0_14 = arith.constant 0 : index
    %c0_15 = arith.constant 0 : index
    %19 = vector.load %arg5[%c0_13, %c8, %c0_14, %c0_15] : memref<1x16x8x8xf32, #tpu.memory_space<vmem>>, vector<1x1x8x8xf32>
    %20 = vector.shape_cast %19 : vector<1x1x8x8xf32> to vector<8x8xf32>
    %21 = vector.shape_cast %18 : vector<8x8xf32> to vector<1x1x8x8xf32>
    tpu.vector_store %arg5[%c0_13, %c8, %c0_14, %c0_15], %21 {strides = array<i32>} : memref<1x16x8x8xf32, #tpu.memory_space<vmem>>, vector<1x1x8x8xf32>,
    %22 = vector.extract_strided_slice %6 {offsets = [3, 0, 0], sizes = [1, 8, 8], strides = [1, 1, 1]} : vector<4x8x8xf32> to vector<1x8x8xf32>
    %23 = vector.shape_cast %22 : vector<1x8x8xf32> to vector<8x8xf32>
    %c0_16 = arith.constant 0 : index
    %c12 = arith.constant 12 : index
    %c0_17 = arith.constant 0 : index
    %c0_18 = arith.constant 0 : index
    %24 = vector.load %arg5[%c0_16, %c12, %c0_17, %c0_18] : memref<1x16x8x8xf32, #tpu.memory_space<vmem>>, vector<1x1x8x8xf32>
    %25 = vector.shape_cast %24 : vector<1x1x8x8xf32> to vector<8x8xf32>
    %26 = vector.shape_cast %23 : vector<8x8xf32> to vector<1x1x8x8xf32>
    tpu.vector_store %arg5[%c0_16, %c12, %c0_17, %c0_18], %26 {strides = array<i32>} : memref<1x16x8x8xf32, #tpu.memory_space<vmem>>, vector<1x1x8x8xf32>,
    %c1 = arith.constant 1 : index
    %c0_19 = arith.constant 0 : index
    %c0_20 = arith.constant 0 : index
    %27 = vector.load %arg4[%c1, %c0_19, %c0_20] : memref<2x16x8xf32, #tpu.memory_space<vmem>>, vector<1x16x8xf32>
    %28 = vector.shape_cast %27 : vector<1x16x8xf32> to vector<16x8xf32>
    %cst_21 = arith.constant dense<0.000000e+00> : vector<32x8xf32>
    %29 = tpu.matmul %2, %28, %cst_21 {dimension_numbers = #tpu.dot_dimension_numbers<[1], [0], [0], [1], [0, 0, 1, 1], [], []>} : vector<32x16xf32>, vector<16x8xf32>, vector<32x8xf32> -> vector<32x8xf32>
    %30 = vector.shape_cast %29 : vector<32x8xf32> to vector<4x8x8xf32>
    %31 = vector.extract_strided_slice %30 {offsets = [0, 0, 0], sizes = [1, 8, 8], strides = [1, 1, 1]} : vector<4x8x8xf32> to vector<1x8x8xf32>
    %32 = vector.shape_cast %31 : vector<1x8x8xf32> to vector<8x8xf32>
    %c0_22 = arith.constant 0 : index
    %c1_23 = arith.constant 1 : index
    %c0_24 = arith.constant 0 : index
    %c0_25 = arith.constant 0 : index
    %33 = vector.load %arg5[%c0_22, %c1_23, %c0_24, %c0_25] : memref<1x16x8x8xf32, #tpu.memory_space<vmem>>, vector<1x1x8x8xf32>
    %34 = vector.shape_cast %33 : vector<1x1x8x8xf32> to vector<8x8xf32>
    %35 = vector.shape_cast %32 : vector<8x8xf32> to vector<1x1x8x8xf32>
    tpu.vector_store %arg5[%c0_22, %c1_23, %c0_24, %c0_25], %35 {strides = array<i32>} : memref<1x16x8x8xf32, #tpu.memory_space<vmem>>, vector<1x1x8x8xf32>,
    %36 = vector.extract_strided_slice %30 {offsets = [1, 0, 0], sizes = [1, 8, 8], strides = [1, 1, 1]} : vector<4x8x8xf32> to vector<1x8x8xf32>
    %37 = vector.shape_cast %36 : vector<1x8x8xf32> to vector<8x8xf32>
    %c0_26 = arith.constant 0 : index
    %c5 = arith.constant 5 : index
    %c0_27 = arith.constant 0 : index
    %c0_28 = arith.constant 0 : index
    %38 = vector.load %arg5[%c0_26, %c5, %c0_27, %c0_28] : memref<1x16x8x8xf32, #tpu.memory_space<vmem>>, vector<1x1x8x8xf32>
    %39 = vector.shape_cast %38 : vector<1x1x8x8xf32> to vector<8x8xf32>
    %40 = vector.shape_cast %37 : vector<8x8xf32> to vector<1x1x8x8xf32>
    tpu.vector_store %arg5[%c0_26, %c5, %c0_27, %c0_28], %40 {strides = array<i32>} : memref<1x16x8x8xf32, #tpu.memory_space<vmem>>, vector<1x1x8x8xf32>,
    %41 = vector.extract_strided_slice %30 {offsets = [2, 0, 0], sizes = [1, 8, 8], strides = [1, 1, 1]} : vector<4x8x8xf32> to vector<1x8x8xf32>
    %42 = vector.shape_cast %41 : vector<1x8x8xf32> to vector<8x8xf32>
    %c0_29 = arith.constant 0 : index
    %c9 = arith.constant 9 : index
    %c0_30 = arith.constant 0 : index
    %c0_31 = arith.constant 0 : index
    %43 = vector.load %arg5[%c0_29, %c9, %c0_30, %c0_31] : memref<1x16x8x8xf32, #tpu.memory_space<vmem>>, vector<1x1x8x8xf32>
    %44 = vector.shape_cast %43 : vector<1x1x8x8xf32> to vector<8x8xf32>
    %45 = vector.shape_cast %42 : vector<8x8xf32> to vector<1x1x8x8xf32>
    tpu.vector_store %arg5[%c0_29, %c9, %c0_30, %c0_31], %45 {strides = array<i32>} : memref<1x16x8x8xf32, #tpu.memory_space<vmem>>, vector<1x1x8x8xf32>,
    %46 = vector.extract_strided_slice %30 {offsets = [3, 0, 0], sizes = [1, 8, 8], strides = [1, 1, 1]} : vector<4x8x8xf32> to vector<1x8x8xf32>
    %47 = vector.shape_cast %46 : vector<1x8x8xf32> to vector<8x8xf32>
    %c0_32 = arith.constant 0 : index
    %c13 = arith.constant 13 : index
    %c0_33 = arith.constant 0 : index
    %c0_34 = arith.constant 0 : index
    %48 = vector.load %arg5[%c0_32, %c13, %c0_33, %c0_34] : memref<1x16x8x8xf32, #tpu.memory_space<vmem>>, vector<1x1x8x8xf32>
    %49 = vector.shape_cast %48 : vector<1x1x8x8xf32> to vector<8x8xf32>
    %50 = vector.shape_cast %47 : vector<8x8xf32> to vector<1x1x8x8xf32>
    tpu.vector_store %arg5[%c0_32, %c13, %c0_33, %c0_34], %50 {strides = array<i32>} : memref<1x16x8x8xf32, #tpu.memory_space<vmem>>, vector<1x1x8x8xf32>,
    %c0_35 = arith.constant 0 : index
    %c0_36 = arith.constant 0 : index
    %c1_37 = arith.constant 1 : index
    %c0_38 = arith.constant 0 : index
    %51 = tpu.strided_load %arg3[%c0_35, %c0_36, %c1_37, %c0_38] {strides = array<i32: 1, 1, 2, 1>} : memref<1x4x16x16xf32, #tpu.memory_space<vmem>>, vector<1x4x8x16xf32>
    %52 = vector.shape_cast %51 : vector<1x4x8x16xf32> to vector<4x8x16xf32>
    %53 = vector.shape_cast %52 : vector<4x8x16xf32> to vector<32x16xf32>
    %c0_39 = arith.constant 0 : index
    %c0_40 = arith.constant 0 : index
    %c0_41 = arith.constant 0 : index
    %54 = vector.load %arg4[%c0_39, %c0_40, %c0_41] : memref<2x16x8xf32, #tpu.memory_space<vmem>>, vector<1x16x8xf32>
    %55 = vector.shape_cast %54 : vector<1x16x8xf32> to vector<16x8xf32>
    %cst_42 = arith.constant dense<0.000000e+00> : vector<32x8xf32>
    %56 = tpu.matmul %53, %55, %cst_42 {dimension_numbers = #tpu.dot_dimension_numbers<[1], [0], [0], [1], [0, 0, 1, 1], [], []>} : vector<32x16xf32>, vector<16x8xf32>, vector<32x8xf32> -> vector<32x8xf32>
    %57 = vector.shape_cast %56 : vector<32x8xf32> to vector<4x8x8xf32>
    %58 = vector.extract_strided_slice %57 {offsets = [0, 0, 0], sizes = [1, 8, 8], strides = [1, 1, 1]} : vector<4x8x8xf32> to vector<1x8x8xf32>
    %59 = vector.shape_cast %58 : vector<1x8x8xf32> to vector<8x8xf32>
    %c0_43 = arith.constant 0 : index
    %c2 = arith.constant 2 : index
    %c0_44 = arith.constant 0 : index
    %c0_45 = arith.constant 0 : index
    %60 = vector.load %arg5[%c0_43, %c2, %c0_44, %c0_45] : memref<1x16x8x8xf32, #tpu.memory_space<vmem>>, vector<1x1x8x8xf32>
    %61 = vector.shape_cast %60 : vector<1x1x8x8xf32> to vector<8x8xf32>
    %62 = vector.shape_cast %59 : vector<8x8xf32> to vector<1x1x8x8xf32>
    tpu.vector_store %arg5[%c0_43, %c2, %c0_44, %c0_45], %62 {strides = array<i32>} : memref<1x16x8x8xf32, #tpu.memory_space<vmem>>, vector<1x1x8x8xf32>,
    %63 = vector.extract_strided_slice %57 {offsets = [1, 0, 0], sizes = [1, 8, 8], strides = [1, 1, 1]} : vector<4x8x8xf32> to vector<1x8x8xf32>
    %64 = vector.shape_cast %63 : vector<1x8x8xf32> to vector<8x8xf32>
    %c0_46 = arith.constant 0 : index
    %c6 = arith.constant 6 : index
    %c0_47 = arith.constant 0 : index
    %c0_48 = arith.constant 0 : index
    %65 = vector.load %arg5[%c0_46, %c6, %c0_47, %c0_48] : memref<1x16x8x8xf32, #tpu.memory_space<vmem>>, vector<1x1x8x8xf32>
    %66 = vector.shape_cast %65 : vector<1x1x8x8xf32> to vector<8x8xf32>
    %67 = vector.shape_cast %64 : vector<8x8xf32> to vector<1x1x8x8xf32>
    tpu.vector_store %arg5[%c0_46, %c6, %c0_47, %c0_48], %67 {strides = array<i32>} : memref<1x16x8x8xf32, #tpu.memory_space<vmem>>, vector<1x1x8x8xf32>,
    %68 = vector.extract_strided_slice %57 {offsets = [2, 0, 0], sizes = [1, 8, 8], strides = [1, 1, 1]} : vector<4x8x8xf32> to vector<1x8x8xf32>
    %69 = vector.shape_cast %68 : vector<1x8x8xf32> to vector<8x8xf32>
    %c0_49 = arith.constant 0 : index
    %c10 = arith.constant 10 : index
    %c0_50 = arith.constant 0 : index
    %c0_51 = arith.constant 0 : index
    %70 = vector.load %arg5[%c0_49, %c10, %c0_50, %c0_51] : memref<1x16x8x8xf32, #tpu.memory_space<vmem>>, vector<1x1x8x8xf32>
    %71 = vector.shape_cast %70 : vector<1x1x8x8xf32> to vector<8x8xf32>
    %72 = vector.shape_cast %69 : vector<8x8xf32> to vector<1x1x8x8xf32>
    tpu.vector_store %arg5[%c0_49, %c10, %c0_50, %c0_51], %72 {strides = array<i32>} : memref<1x16x8x8xf32, #tpu.memory_space<vmem>>, vector<1x1x8x8xf32>,
    %73 = vector.extract_strided_slice %57 {offsets = [3, 0, 0], sizes = [1, 8, 8], strides = [1, 1, 1]} : vector<4x8x8xf32> to vector<1x8x8xf32>
    %74 = vector.shape_cast %73 : vector<1x8x8xf32> to vector<8x8xf32>
    %c0_52 = arith.constant 0 : index
    %c14 = arith.constant 14 : index
    %c0_53 = arith.constant 0 : index
    %c0_54 = arith.constant 0 : index
    %75 = vector.load %arg5[%c0_52, %c14, %c0_53, %c0_54] : memref<1x16x8x8xf32, #tpu.memory_space<vmem>>, vector<1x1x8x8xf32>
    %76 = vector.shape_cast %75 : vector<1x1x8x8xf32> to vector<8x8xf32>
    %77 = vector.shape_cast %74 : vector<8x8xf32> to vector<1x1x8x8xf32>
    tpu.vector_store %arg5[%c0_52, %c14, %c0_53, %c0_54], %77 {strides = array<i32>} : memref<1x16x8x8xf32, #tpu.memory_space<vmem>>, vector<1x1x8x8xf32>,
    %c1_55 = arith.constant 1 : index
    %c0_56 = arith.constant 0 : index
    %c0_57 = arith.constant 0 : index
    %78 = vector.load %arg4[%c1_55, %c0_56, %c0_57] : memref<2x16x8xf32, #tpu.memory_space<vmem>>, vector<1x16x8xf32>
    %79 = vector.shape_cast %78 : vector<1x16x8xf32> to vector<16x8xf32>
    %cst_58 = arith.constant dense<0.000000e+00> : vector<32x8xf32>
    %80 = tpu.matmul %53, %79, %cst_58 {dimension_numbers = #tpu.dot_dimension_numbers<[1], [0], [0], [1], [0, 0, 1, 1], [], []>} : vector<32x16xf32>, vector<16x8xf32>, vector<32x8xf32> -> vector<32x8xf32>
    %81 = vector.shape_cast %80 : vector<32x8xf32> to vector<4x8x8xf32>
    %82 = vector.extract_strided_slice %81 {offsets = [0, 0, 0], sizes = [1, 8, 8], strides = [1, 1, 1]} : vector<4x8x8xf32> to vector<1x8x8xf32>
    %83 = vector.shape_cast %82 : vector<1x8x8xf32> to vector<8x8xf32>
    %c0_59 = arith.constant 0 : index
    %c3 = arith.constant 3 : index
    %c0_60 = arith.constant 0 : index
    %c0_61 = arith.constant 0 : index
    %84 = vector.load %arg5[%c0_59, %c3, %c0_60, %c0_61] : memref<1x16x8x8xf32, #tpu.memory_space<vmem>>, vector<1x1x8x8xf32>
    %85 = vector.shape_cast %84 : vector<1x1x8x8xf32> to vector<8x8xf32>
    %86 = vector.shape_cast %83 : vector<8x8xf32> to vector<1x1x8x8xf32>
    tpu.vector_store %arg5[%c0_59, %c3, %c0_60, %c0_61], %86 {strides = array<i32>} : memref<1x16x8x8xf32, #tpu.memory_space<vmem>>, vector<1x1x8x8xf32>,
    %87 = vector.extract_strided_slice %81 {offsets = [1, 0, 0], sizes = [1, 8, 8], strides = [1, 1, 1]} : vector<4x8x8xf32> to vector<1x8x8xf32>
    %88 = vector.shape_cast %87 : vector<1x8x8xf32> to vector<8x8xf32>
    %c0_62 = arith.constant 0 : index
    %c7 = arith.constant 7 : index
    %c0_63 = arith.constant 0 : index
    %c0_64 = arith.constant 0 : index
    %89 = vector.load %arg5[%c0_62, %c7, %c0_63, %c0_64] : memref<1x16x8x8xf32, #tpu.memory_space<vmem>>, vector<1x1x8x8xf32>
    %90 = vector.shape_cast %89 : vector<1x1x8x8xf32> to vector<8x8xf32>
    %91 = vector.shape_cast %88 : vector<8x8xf32> to vector<1x1x8x8xf32>
    tpu.vector_store %arg5[%c0_62, %c7, %c0_63, %c0_64], %91 {strides = array<i32>} : memref<1x16x8x8xf32, #tpu.memory_space<vmem>>, vector<1x1x8x8xf32>,
    %92 = vector.extract_strided_slice %81 {offsets = [2, 0, 0], sizes = [1, 8, 8], strides = [1, 1, 1]} : vector<4x8x8xf32> to vector<1x8x8xf32>
    %93 = vector.shape_cast %92 : vector<1x8x8xf32> to vector<8x8xf32>
    %c0_65 = arith.constant 0 : index
    %c11 = arith.constant 11 : index
    %c0_66 = arith.constant 0 : index
    %c0_67 = arith.constant 0 : index
    %94 = vector.load %arg5[%c0_65, %c11, %c0_66, %c0_67] : memref<1x16x8x8xf32, #tpu.memory_space<vmem>>, vector<1x1x8x8xf32>
    %95 = vector.shape_cast %94 : vector<1x1x8x8xf32> to vector<8x8xf32>
    %96 = vector.shape_cast %93 : vector<8x8xf32> to vector<1x1x8x8xf32>
    tpu.vector_store %arg5[%c0_65, %c11, %c0_66, %c0_67], %96 {strides = array<i32>} : memref<1x16x8x8xf32, #tpu.memory_space<vmem>>, vector<1x1x8x8xf32>,
    %97 = vector.extract_strided_slice %81 {offsets = [3, 0, 0], sizes = [1, 8, 8], strides = [1, 1, 1]} : vector<4x8x8xf32> to vector<1x8x8xf32>
    %98 = vector.shape_cast %97 : vector<1x8x8xf32> to vector<8x8xf32>
    %c0_68 = arith.constant 0 : index
    %c15 = arith.constant 15 : index
    %c0_69 = arith.constant 0 : index
    %c0_70 = arith.constant 0 : index
    %99 = vector.load %arg5[%c0_68, %c15, %c0_69, %c0_70] : memref<1x16x8x8xf32, #tpu.memory_space<vmem>>, vector<1x1x8x8xf32>
    %100 = vector.shape_cast %99 : vector<1x1x8x8xf32> to vector<8x8xf32>
    %101 = vector.shape_cast %98 : vector<8x8xf32> to vector<1x1x8x8xf32>
    tpu.vector_store %arg5[%c0_68, %c15, %c0_69, %c0_70], %101 {strides = array<i32>} : memref<1x16x8x8xf32, #tpu.memory_space<vmem>>, vector<1x1x8x8xf32>,
    return
  }
  func.func @transform_0(%arg0: i32, %arg1: i32, %arg2: i32) -> (i32, i32, i32, i32) {
    %c0_i32 = arith.constant 0 : i32
    %c0_i32_0 = arith.constant 0 : i32
    return %arg0, %arg1, %arg2, %c0_i32 : i32, i32, i32, i32
  }
  func.func @transform_1(%arg0: i32, %arg1: i32, %arg2: i32) -> (i32, i32, i32) {
    %c0_i32 = arith.constant 0 : i32
    %c0_i32_0 = arith.constant 0 : i32
    %c0_i32_1 = arith.constant 0 : i32
    %c0_i32_2 = arith.constant 0 : i32
    return %c0_i32, %c0_i32_0, %c0_i32_1 : i32, i32, i32
  }
  func.func @transform_2(%arg0: i32, %arg1: i32, %arg2: i32) -> (i32, i32, i32, i32) {
    %c0_i32 = arith.constant 0 : i32
    %c0_i32_0 = arith.constant 0 : i32
    return %arg0, %arg1, %arg2, %c0_i32 : i32, i32, i32, i32
  }
}

</mosaic_0001>

<bundles_post_ra>
// kernel: space_to_depth.1
= control target key start
LH: loop header
LB: loop body
LE: loop exit
PB: predicated region body
PF: predicated region fallthrough
CT: control target
= control target key end

     0   :  { %7 = vsyncpa [#allocation3], 0  ;;  %s1329_s0 = inlined_call_operand.hbm [shape: f32[2,4,16,16], index: 0, kind: input, shape index: {}]   ;;  %s1330_s1 = inlined_call_operand.hbm [shape: f32[2,16,8], index: 1, kind: input, shape index: {}]   ;;  %s1331_s2 = inlined_call_operand.vmem [shape: f32[2,16,8,8], index: 2, kind: output, shape index: {}]  }
   0x1   :  { %9 = vsyncpa [#allocation3 + $0x1], 0 }
   0x2   :  { %10 = vsyncpa [#allocation5], 0  ;;  %s1105_s9 = smov 0   ;;  %s1107_s10 = smov 0  }
   0x3   :  { %s1109_s11 = smov 0   ;;  %s1111_s12 = smov 0  }
   0x4   :  { %s1113_s13 = smov 0   ;;  %s1115_s14 = smov 0  }
   0x5 LB: > { %s769_s15 = sadd.s32 4294967295, %s1084_s14   ;;  %p59_p0 = scmp.ne.s32.totalorder %s1068_s10, %s1064_s9  ;;  %s1084_s14 = sphi %s1115_s14, %s16_s14   ;;  %s1080_s13 = sphi %s1113_s13, %s1348_s13   ;;  %s1076_s12 = sphi %s1111_s12, %s1347_s12   ;;  %s1072_s11 = sphi %s1109_s11, %s1346_s11   ;;  %s1068_s10 = sphi %s1107_s10, %s1345_s10   ;;  %s1064_s9 = sphi %s1105_s9, %s1344_s9  }
   0x6   : > { %p1135_p1 = scmp.eq.s32.totalorder %s769_s15, 0  ;;  %p771_p2 = scmp.ge.s32.totalorder %s1084_s14, 1 }
   0x7   : > { %p121_p3 = scmp.lt.s32.totalorder %s1084_s14, 3  ;;  %s1086_s19 = smov [#allocation4]  }
   0x8   : > { %s1336_s16 = scalar_select %p1135_p1, 1, 0 }
   0x9   : > { %p1143_p4 = por %p1135_p1, %p59_p0  ;;  %p1147_p5 = pnand %p771_p2, %p121_p3 }
   0xa   : > { %s133_s20 = sshll.u32 %s1086_s19, 4  ;;  %s35_s22 = sadd.s32 1, %s1080_s13  ;;  %s134_s20 = int_to_ptr.vmem [resolvable:$true] %s133_s20 }
   0xb   : > { %s1337_s17 = scalar_select %p1143_p4, 1, 0 }
   0xc   : > { %s1338_s18 = scalar_select %p1147_p5, 1, 0 }
   0xd   : > { %p910_p6 = pneg %p1147_p5  ;;  %s972_s25 = scalar_lea.hbm %s1330_s1, 512 }
   0xe   : > { %p973_p8 = scmp.ne.s32.totalorder %s1330_s1, %s972_s25  ;;  %p979_p12 = scmp.lt.u32.totalorder %s972_s25, %s1330_s1 }
   0xf   : > { %p1155_p7 = pnand %p910_p6, %p1135_p1 }
  0x11   : > { %p974_p9 = pneg %p1155_p7 }
  0x13   : > { %p975_p10 = pnand %p974_p9, %p973_p8 }
  0x15   : > { %p976_p11 = pneg %p975_p10 }
  0x17   : > { %p981_p13 = pnand %p979_p12, %p976_p11 }
  0x19   : > { %984 = shalt.err (!%p981_p13)
}
  0x1a   : > { %s985_s30 = scalar_lea.vmem %s134_s20, 512  ;;  %p993_p6 = scmp.lt.s32.totalorder %s134_s20, %s134_s20 }
  0x1b   : > { %p986_p0 = scmp.ne.s32.totalorder %s134_s20, %s985_s30  ;;  %p994_p1 = scmp.lt.s32.totalorder %s985_s30, %s985_s30 }
  0x1d   : > { %p988_p2 = pnand %p986_p0, %p974_p9  ;;  %p995_p4 = por %p994_p1, %p993_p6 }
  0x1f   : > { %p989_p3 = pneg %p988_p2 }
  0x21   : > { %p996_p5 = pnand %p995_p4, %p989_p3 }
  0x23   : > { %999 = shalt.err (!%p996_p5)
}
  0x24   : > { %s1087_s3 = smov 128   ;;  %s1088_s4 = smov 8  }
  0x25   : > { %913 = dma.hbm_to_vmem [thread:$0]  (!%p1155_p7), %s1330_s1, 512, %s134_s20, [#allocation5], %s1087_s3, %s1087_s3, %s1088_s4  }
  0x26   : > { %p37_p1 = scmp.ge.s32.totalorder %s35_s22, 2  ;;  %s46_s7 = sadd.s32 1, %s1072_s11 }
  0x27   : > { %p53_p4 = scmp.ne.s32.totalorder %s1072_s11, %s1068_s10  ;;  %p54_p5 = scmp.eq.s32.totalorder %s1084_s14, 0 }
  0x28   : > { %s1350_s22 = smov (%p37_p1, %s35_s22), 0  ;;  %p919_p9 = scmp.lt.s32.totalorder %s1084_s14, 2 }
  0x29   : > { %p55_p8 = por %p54_p5, %p53_p4  ;;  %s39_s8 = ssub.s32 %s1080_s13, %s1350_s22 }
  0x2a   : > { %s147_s9 = sand.u32 1, %s1072_s11   ;;  %p44_p10 = scmp.eq.s32.totalorder %s39_s8, 0 }
  0x2b   : > { %s774_s15 = sshll.u32 %s147_s9, 6  ;;  %s822_s19 = sshll.u32 %s1080_s13, 10 }
  0x2c   : > { %s1191_s21 = scalar_select %p44_p10, %s1072_s11, %s46_s7  }
  0x2d   : > { %s1196_s20 = scalar_lea.hbm %s1329_s0, %s822_s19  ;;  %s151_s25 = scalar_lea.vmem [#allocation2], %s774_s15 }
  0x2e   : > { %s163_s26 = sshll.u32 %s151_s25, 4  ;;  %p1198_p7 = pnand %p919_p9, %p55_p8  ;;  %s1202_s26 = int_to_ptr.vmem [resolvable:$true] %s163_s26 }
  0x2f   : > { %s1204_s28 = scalar_lea.sflag [#allocation3], %s147_s9  ;;  %s1000_s29 = scalar_lea.hbm %s1196_s20, 1024 }
  0x30   : > { %p1001_p11 = scmp.ne.s32.totalorder %s1196_s20, %s1000_s29  ;;  %p1002_p12 = pneg %p1198_p7 }
  0x31   : > { %s1005_s6 = scalar_lea.hbm %s1329_s0, 2048  ;;  %p1006_p2 = scmp.lt.u32.totalorder %s1196_s20, %s1329_s0 }
  0x32   : > { %p1003_p13 = pnand %p1002_p12, %p1001_p11  ;;  %p1007_p3 = scmp.lt.u32.totalorder %s1005_s6, %s1000_s29 }
  0x33   : > { %p1009_p1 = scmp.lt.u32.totalorder %s1000_s29, %s1196_s20 }
  0x34   : > { %p1004_p0 = pneg %p1003_p13  ;;  %p1008_p6 = por %p1007_p3, %p1006_p2 }
  0x36   : > { %p1010_p4 = por %p1009_p1, %p1008_p6 }
  0x38   : > { %p1011_p5 = pnand %p1010_p4, %p1004_p0 }
  0x3a   : > { %1014 = shalt.err (!%p1011_p5)
}
  0x3b   : > { %s1015_s9 = scalar_lea.vmem %s1202_s26, 1024  ;;  %s1089_s15 = smov [#allocation2]  }
  0x3c   : > { %p1016_p8 = scmp.ne.s32.totalorder %s1202_s26, %s1015_s9  ;;  %s1020_s19 = sshll.u32 %s1089_s15, 4  ;;  %s1021_s19 = int_to_ptr.vmem [resolvable:$false] %s1020_s19 }
  0x3d   : > { %s1022_s23 = scalar_lea.vmem %s1021_s19, 2048  ;;  %p1023_p11 = scmp.lt.s32.totalorder %s1202_s26, %s1021_s19 }
  0x3e   : > { %p1018_p9 = pnand %p1016_p8, %p1002_p12  ;;  %p1024_p13 = scmp.lt.s32.totalorder %s1022_s23, %s1015_s9 }
  0x40   : > { %p1019_p10 = pneg %p1018_p9  ;;  %p1025_p2 = por %p1024_p13, %p1023_p11 }
  0x42   : > { %p1026_p3 = pnand %p1025_p2, %p1019_p10 }
  0x44   : > { %1029 = shalt.err (!%p1026_p3)
}
  0x45   : > { %917 = dma.hbm_to_vmem [thread:$0]  (!%p1198_p7), %s1196_s20, 1024, %s1202_s26, %s1204_s28, %s1087_s3, %s1087_s3, %s1088_s4  }
  0x46   : > { %p1341_p12 = scmp.ne.s32.totalorder %s1338_s18, 0 }
  0x47   : > { %s177_s24 = sand.u32 (!%p1341_p12), 1, %s1068_s10   ;;  %p1342_p0 = scmp.ne.s32.totalorder (!%p1341_p12), %s1337_s17, 0 }
  0x48   : > { %175 = sbr.rel (%p1341_p12) target bundleno = 317 (0x13d), region = 28  ;;  %s778_s25 = sshll.u32 (!%p1341_p12), %s177_s24, 6 }
  0x49   : > { %s178_s29 = scalar_lea.sflag (!%p1341_p12), [#allocation3], %s177_s24  ;;  %s1238_s30 = scalar_lea.vmem (!%p1341_p12), [#allocation2], %s778_s25 }
  0x4f   : > { %1055 = dma.done.wait (%p1342_p0), %s178_s29, 1024  }
  0x50   : > { %1057 = vsyncadd (%p1342_p0), %s178_s29, 4294966272  ;;  %p1343_p6 = scmp.ne.s32.totalorder %s1336_s16, 0 }
  0x52   : > { %1059 = dma.done.wait (%p1343_p6), [#allocation5], 512  }
  0x53   : > { %1061 = vsyncadd (%p1343_p6), [#allocation5], 4294966784  ;;  %vm237_vm0 = vcmask 130048   ;;  %v235_v0 = vld [vmem:[#allocation4] sm:$0xff]  ;;  %v236_v1 = vld [vmem:[#allocation4 + $0x8] sm:$0xff]  ;;  %p216_p7 = scmp.lt.s32.totalorder %s1076_s12, 1 }
  0x54   : > { %v344_v2 = vld [vmem:[#allocation4 + $0x10] sm:$0xff]  ;;  %v888_v3 = vpack.c.bf16 %v236_v1, %v235_v0  ;;  %v345_v4 = vld [vmem:[#allocation4 + $0x18] sm:$0xff]  ;;  %v228_v5 = vld [vmem:[%s1238_s30] ss:$2 sm:$0xff]  ;;  %vm335_vm1 = vcmask 64512  }
  0x55   : > { %v892_v6 = vpack.c.bf16 %v345_v4, %v344_v2  ;;  %852 = vmatprep.mubr.msk.f32.mxu0 %vm237_vm0, %v228_v5  ;;  %862 = vmatprep.mubr.msk.f32.mxu1 %vm237_vm0, %v228_v5  ;;  %v782_v7 = vld [vmem:[%s1238_s30 + $0x10] ss:$2 sm:$0xff]  ;;  %v783_v8 = vld [vmem:[%s1238_s30 + $0x20] ss:$2 sm:$0xff]  ;;  %v800_v10 = vld [vmem:[%s1238_s30 + $0x1] ss:$2 sm:$0xff] }
  0x56   : > { %889 = vmatprep.subr.bf16.mxu0 %v888_v3  ;;  %v784_v9 = vld [vmem:[%s1238_s30 + $0x30] ss:$2 sm:$0xff]  ;;  %v801_v11 = vld [vmem:[%s1238_s30 + $0x11] ss:$2 sm:$0xff]  ;;  %v802_v12 = vld [vmem:[%s1238_s30 + $0x21] ss:$2 sm:$0xff] }
  0x57   : > { %893 = vmatprep.subr.bf16.mxu1 %v892_v6  ;;  %891 = vmatpush3.bf16.msra.mxu0 %v888_v3  ;;  %v803_v13 = vld [vmem:[%s1238_s30 + $0x31] ss:$2 sm:$0xff]  ;;  %s1352_s12 = smov (!%p216_p7, %s1076_s12), 1 }
  0x58   : > { %895 = vmatpush3.bf16.msra.mxu1 %v892_v6  ;;  %897 = vmatprep.subr.bf16.mxu0 %v888_v3  ;;  %s823_s16 = sshll.u32 %s1352_s12, 7 }
  0x59   : > { %901 = vmatprep.subr.bf16.mxu1 %v892_v6  ;;  %s1277_s3 = scalar_lea.vmem %s1331_s2, %s823_s16 }
  0x5a   : > { %853 = vmatmul.mubr.msk.f32.vlgmr.msra.gmra.mrb[0].mxu0 %vm237_vm0, %v782_v7 }
  0x5b   : > { %863 = vmatmul.mubr.msk.f32.vlgmr.msra.gmra.mrb[0].mxu1 %vm237_vm0, %v782_v7  ;;  %899 = vmatpush3.bf16.msra.mxu0 %v888_v3 }
  0x5c   : > { %903 = vmatpush3.bf16.msra.mxu1 %v892_v6  ;;  %855 = vmatprep.mubr.msk.f32.mxu0 %vm237_vm0, %v783_v8 }
  0x5d   : > { %865 = vmatprep.mubr.msk.f32.mxu1 %vm237_vm0, %v783_v8 }
  0x5e   : > { %856 = vmatmul.mubr.msk.f32.gmra.mrb[2].mxu0 %vm237_vm0, %v784_v9 }
  0x5f   : > { %866 = vmatmul.mubr.msk.f32.gmra.mrb[2].mxu1 %vm237_vm0, %v784_v9  ;;  %872 = vmatprep.mubr.msk.f32.mxu0 %vm237_vm0, %v800_v10 }
  0x60   : > { %882 = vmatprep.mubr.msk.f32.mxu1 %vm237_vm0, %v800_v10 }
  0x62   : > { %873 = vmatmul.mubr.msk.f32.vlgmr.msra.gmra.mrb[4].mxu0 %vm237_vm0, %v801_v11 }
  0x63   : > { %883 = vmatmul.mubr.msk.f32.vlgmr.msra.gmra.mrb[4].mxu1 %vm237_vm0, %v801_v11  ;;  %875 = vmatprep.mubr.msk.f32.mxu0 %vm237_vm0, %v802_v12 }
  0x64   : > { %885 = vmatprep.mubr.msk.f32.mxu1 %vm237_vm0, %v802_v12 }
  0x66   : > { %876 = vmatmul.mubr.msk.f32.gmra.mrb[6].mxu0 %vm237_vm0, %v803_v13 }
  0x67   : > { %886 = vmatmul.mubr.msk.f32.gmra.mrb[6].mxu1 %vm237_vm0, %v803_v13 }
 0x12d   : > { %v854_v14 = vpop.f32.mrb[0].mxu0 }
 0x12e   : > { %789 = vst.msk [vmem:[%s1277_s3 + $0x20] sm:$0xff] %vm335_vm1, %v854_v14  ;;  %v864_v15 = vpop.f32.mrb[0].mxu1  ;;  %v316_v16 = vpop.f32.mrb[1].mxu0 }
 0x12f   : > { %797 = vst.msk [vmem:[%s1277_s3 + $0x28] sm:$0xff] %vm335_vm1, %v864_v15  ;;  %336 = vst.msk [vmem:[%s1277_s3] sm:$0xff] %vm335_vm1, %v316_v16  ;;  %v412_v17 = vpop.f32.mrb[1].mxu1 }
 0x130   : > { %796 = vst.msk [vmem:[%s1277_s3 + $0x8] sm:$0xff] %vm335_vm1, %v412_v17 }
 0x131   : > { %v857_v18 = vpop.f32.mrb[2].mxu0 }
 0x132   : > { %791 = vst.msk [vmem:[%s1277_s3 + $0x60] sm:$0xff] %vm335_vm1, %v857_v18  ;;  %v867_v19 = vpop.f32.mrb[2].mxu1  ;;  %v326_v20 = vpop.f32.mrb[3].mxu0 }
 0x133   : > { %799 = vst.msk [vmem:[%s1277_s3 + $0x68] sm:$0xff] %vm335_vm1, %v867_v19  ;;  %790 = vst.msk [vmem:[%s1277_s3 + $0x40] sm:$0xff] %vm335_vm1, %v326_v20  ;;  %v422_v21 = vpop.f32.mrb[3].mxu1 }
 0x134   : > { %798 = vst.msk [vmem:[%s1277_s3 + $0x48] sm:$0xff] %vm335_vm1, %v422_v21 }
 0x135   : > { %v874_v22 = vpop.f32.mrb[4].mxu0 }
 0x136   : > { %809 = vst.msk [vmem:[%s1277_s3 + $0x30] sm:$0xff] %vm335_vm1, %v874_v22  ;;  %v884_v23 = vpop.f32.mrb[4].mxu1  ;;  %v527_v24 = vpop.f32.mrb[5].mxu0 }
 0x137   : > { %817 = vst.msk [vmem:[%s1277_s3 + $0x38] sm:$0xff] %vm335_vm1, %v884_v23  ;;  %808 = vst.msk [vmem:[%s1277_s3 + $0x10] sm:$0xff] %vm335_vm1, %v527_v24  ;;  %v622_v25 = vpop.f32.mrb[5].mxu1 }
 0x138   : > { %816 = vst.msk [vmem:[%s1277_s3 + $0x18] sm:$0xff] %vm335_vm1, %v622_v25 }
 0x139   : > { %v877_v26 = vpop.f32.mrb[6].mxu0 }
 0x13a   : > { %811 = vst.msk [vmem:[%s1277_s3 + $0x70] sm:$0xff] %vm335_vm1, %v877_v26  ;;  %v887_v27 = vpop.f32.mrb[6].mxu1  ;;  %v537_v28 = vpop.f32.mrb[7].mxu0 }
 0x13b   : > { %819 = vst.msk [vmem:[%s1277_s3 + $0x78] sm:$0xff] %vm335_vm1, %v887_v27  ;;  %810 = vst.msk [vmem:[%s1277_s3 + $0x50] sm:$0xff] %vm335_vm1, %v537_v28  ;;  %v632_v29 = vpop.f32.mrb[7].mxu1 }
 0x13c   : > { %818 = vst.msk [vmem:[%s1277_s3 + $0x58] sm:$0xff] %vm335_vm1, %v632_v29 }
 0x13d PF: > { %s16_s14 = sadd.s32 1, %s1084_s14   ;;  %s1344_s9 = smov %s1068_s10 }
 0x13e   : > { %p13_p1 = scmp.ge.s32.totalorder %s16_s14, 4   ;;  %s1345_s10 = smov %s1072_s11 }
 0x13f   : > { %s1346_s11 = smov %s1191_s21  ;;  %s1347_s12 = smov %s1080_s13 }
 0x140   : > { %s1348_s13 = smov %s1350_s22  ;;  %15 = sbr.rel (!%p13_p1) target bundleno = 5 (0x5), region = 95 }
 0x147   :  { %685 = vsyncpa [#allocation3], 1 }
 0x148   :  { %687 = vsyncpa [#allocation3 + $0x1], 1 }
 0x149   :  { %688 = vsyncpa [#allocation5], 1 }

</bundles_post_ra>
